<compile_context>
chip_gen: v7x
topology: tpu7x:2x2x1
jax: 0.10.0
libtpu: 0.0.40
codegen_flags: <defaults>
</compile_context>

<pallas_src>
import jax
import jax.numpy as jnp
from jax.experimental import pallas as pl
from jax.experimental.pallas import tpu as pltpu

F_IN = 784
H1 = 512
H2 = 256
N_PAD = 128      # final-layer weight padded to 128 lane-dense cols (col 0 is real)
TB_MAX = 1024    # max batch tile; ~14 MiB VMEM (f32 x double-buffered + weights
                 # + activations) -> fits v7x's 32 MiB scoped default with margin


def _round_up(x, m):
    return (x + m - 1) // m * m


def _pick_block_b(B):
    """Batch-tile size. Big tiles amortize per-step overhead; >=2 tiles for
    B > 256 so the parallel grid axis can use both v7x TensorCores."""
    if B > 256:
        return min(TB_MAX, _round_up(pl.cdiv(B, 2), 256))
    # Tiny batches (e.g. tests): one tile, rounded to the sublane multiple.
    return max(8, _round_up(B, 8))


def _disc_kernel(x_ref, w1_ref, b1_ref, w2_ref, b2_ref, w3_ref, b3_ref, o_ref):
    # x_ref: (TB, 784) f32 (cast to bf16 here — avoids a wrapper-side HBM copy).
    # Weights bf16, biases f32.  Three MXU matmuls with f32 accumulation,
    # LeakyReLU(0.2) on the VPU in f32 (v5e-safe), sigmoid on the EUP.
    x = x_ref[...].astype(jnp.bfloat16)

    # Linear(784->512) + LeakyReLU(0.2).  Dropout(0.3) is identity in eval mode.
    h1 = jnp.dot(x, w1_ref[...], preferred_element_type=jnp.float32) + b1_ref[...]
    h1 = jnp.maximum(h1, 0.2 * h1)

    # Linear(512->256) + LeakyReLU(0.2).  Dropout(0.3) is identity in eval mode.
    h2 = jnp.dot(h1.astype(jnp.bfloat16), w2_ref[...],
                 preferred_element_type=jnp.float32) + b2_ref[...]
    h2 = jnp.maximum(h2, 0.2 * h2)

    # Linear(256->1) + Sigmoid.  w3 is zero-padded to 128 output lanes so the
    # MXU matmul is lane-dense; only column 0 is kept, so the output written to
    # HBM is a single f32 per row (4 B/row instead of 512 B/row).
    logits = jnp.dot(h2.astype(jnp.bfloat16), w3_ref[...],
                     preferred_element_type=jnp.float32)
    logit0 = logits[:, :1] + b3_ref[...]          # (TB, 1) + (1, 1)
    o_ref[...] = jax.nn.sigmoid(logit0)


def prepare_params(w1, b1, w2, b2, w3, b3):
    """One-time weight/bias cast + pad (hoisted off the per-call critical path).

    Weights are (in, out), biases (1, out) — i.e. transposed relative to
    PyTorch's nn.Linear weight layout — so the kernel computes y = x @ W + b
    directly on the MXU."""
    w1_p = w1.astype(jnp.bfloat16)                                   # (784, 512)
    w2_p = w2.astype(jnp.bfloat16)                                   # (512, 256)
    w3_p = jnp.zeros((H2, N_PAD), jnp.bfloat16).at[:, :1].set(w3.astype(jnp.bfloat16))
    b1_p = b1.reshape(1, H1).astype(jnp.float32)
    b2_p = b2.reshape(1, H2).astype(jnp.float32)
    b3_p = b3.reshape(1, 1).astype(jnp.float32)
    return w1_p, b1_p, w2_p, b2_p, w3_p, b3_p


def discriminator_forward(x, prepared_params):
    """x: (B, 784) f32.  prepared_params: output of prepare_params()."""
    B = x.shape[0]
    assert x.shape[1] == F_IN
    w1_p, b1_p, w2_p, b2_p, w3_p, b3_p = prepared_params

    # Round the batch up to a sublane multiple (tiny pad, only for odd batches).
    b8 = _round_up(B, 8)
    if b8 != B:
        x = jnp.pad(x, ((0, b8 - B), (0, 0)))

    block_b = _pick_block_b(b8)
    grid_b = pl.cdiv(b8, block_b)

    out = pl.pallas_call(
        _disc_kernel,
        out_shape=jax.ShapeDtypeStruct((b8, 1), jnp.float32),
        grid=(grid_b,),
        in_specs=[
            # Activations: tiled along the batch grid axis, full 784 features
            # (== full last dim, so no lane padding / no wrapper copy needed).
            # TODO(synk): on v6e, if a profile shows the x DMA exposed, add
            # pipeline_mode=pl.Buffered(3) here.
            pl.BlockSpec((block_b, F_IN), lambda i: (i, 0)),
            # Weights / biases: full-array blocks, constant index_map ->
            # resident in VMEM across all grid steps (no re-DMA per tile).
            pl.BlockSpec((F_IN, H1), lambda i: (0, 0)),    # w1 (784, 512) bf16
            pl.BlockSpec((1, H1), lambda i: (0, 0)),       # b1 (1, 512)   f32
            pl.BlockSpec((H1, H2), lambda i: (0, 0)),      # w2 (512, 256) bf16
            pl.BlockSpec((1, H2), lambda i: (0, 0)),       # b2 (1, 256)   f32
            pl.BlockSpec((H2, N_PAD), lambda i: (0, 0)),   # w3 (256, 128) bf16
            pl.BlockSpec((1, 1), lambda i: (0, 0)),        # b3 (1, 1)     f32
        ],
        out_specs=pl.BlockSpec((block_b, 1), lambda i: (i, 0)),
        compiler_params=pltpu.CompilerParams(
            dimension_semantics=("parallel",),   # shard batch tiles across TCs
        ),
    )(x, w1_p, b1_p, w2_p, b2_p, w3_p, b3_p)

    return out[:B]


def init_params(key):
    """PyTorch nn.Linear default init: U(-1/sqrt(fan_in), 1/sqrt(fan_in))."""
    def linear(key, fan_in, fan_out):
        kw, kb = jax.random.split(key)
        bound = 1.0 / jnp.sqrt(fan_in)
        w = jax.random.uniform(kw, (fan_in, fan_out), jnp.float32, -bound, bound)
        b = jax.random.uniform(kb, (1, fan_out), jnp.float32, -bound, bound)
        return w, b

    k1, k2, k3 = jax.random.split(key, 3)
    w1, b1 = linear(k1, F_IN, H1)
    w2, b2 = linear(k2, H1, H2)
    w3, b3 = linear(k3, H2, 1)
    return w1, b1, w2, b2, w3, b3


def _reference_forward(x, w1, b1, w2, b2, w3, b3):
    h1 = x @ w1 + b1
    h1 = jnp.where(h1 > 0, h1, 0.2 * h1)
    h2 = h1 @ w2 + b2
    h2 = jnp.where(h2 > 0, h2, 0.2 * h2)
    return jax.nn.sigmoid(h2 @ w3 + b3)


if __name__ == "__main__":
    key = jax.random.PRNGKey(0)
    k_params, k_x = jax.random.split(key)

    params = init_params(k_params)
    prepared = prepare_params(*params)       # one-time weight prep

    batch = 8
    x = jax.random.normal(k_x, (batch, F_IN), jnp.float32)

    out = discriminator_forward(x, prepared)
    out = jax.block_until_ready(out)

    ref = _reference_forward(x, *params)
    assert out.shape == (batch, 1), out.shape
    # bf16 matmul inputs with f32 accumulation -> relaxed tolerance vs f32 ref.
    max_err = jnp.max(jnp.abs(out - ref))
    assert jnp.allclose(out, ref, atol=2e-2, rtol=2e-2), f"max abs err {max_err}"
    print("KERNEL_OK")
</pallas_src>

<mosaic_0001>
module attributes {stable_mosaic.version = 11 : i64} {
  func.func @_disc_kernel(%arg0: i32, %arg1: memref<8x784xf32, #tpu.memory_space<vmem>>, %arg2: memref<784x512xbf16, #tpu.memory_space<vmem>>, %arg3: memref<1x512xf32, #tpu.memory_space<vmem>>, %arg4: memref<512x256xbf16, #tpu.memory_space<vmem>>, %arg5: memref<1x256xf32, #tpu.memory_space<vmem>>, %arg6: memref<256x128xbf16, #tpu.memory_space<vmem>>, %arg7: memref<1x1xf32, #tpu.memory_space<vmem>>, %arg8: memref<8x1xf32, #tpu.memory_space<vmem>>) attributes {dimension_semantics = [#tpu.dimension_semantics<parallel>], iteration_bounds = array<i64: 1>, scalar_prefetch = 0 : i64, scratch_operands = 0 : i64, tpu.core_type = #tpu.core_type<tc>, window_params = [{transform_indices = @transform_0, window_bounds = array<i64: 8, 784>}, {pipeline_mode = #tpu.pipeline_mode<synchronous>, transform_indices = @transform_1, window_bounds = array<i64: 784, 512>}, {pipeline_mode = #tpu.pipeline_mode<synchronous>, transform_indices = @transform_2, window_bounds = array<i64: 1, 512>}, {pipeline_mode = #tpu.pipeline_mode<synchronous>, transform_indices = @transform_3, window_bounds = array<i64: 512, 256>}, {pipeline_mode = #tpu.pipeline_mode<synchronous>, transform_indices = @transform_4, window_bounds = array<i64: 1, 256>}, {pipeline_mode = #tpu.pipeline_mode<synchronous>, transform_indices = @transform_5, window_bounds = array<i64: 256, 128>}, {pipeline_mode = #tpu.pipeline_mode<synchronous>, transform_indices = @transform_6, window_bounds = array<i64: 1, 1>}, {transform_indices = @transform_7, window_bounds = array<i64: 8, 1>}]} {
    %c0 = arith.constant 0 : index
    %c0_0 = arith.constant 0 : index
    %0 = vector.load %arg1[%c0, %c0_0] : memref<8x784xf32, #tpu.memory_space<vmem>>, vector<8x784xf32>
    %1 = arith.truncf %0 : vector<8x784xf32> to vector<8x784xbf16>
    %c0_1 = arith.constant 0 : index
    %c0_2 = arith.constant 0 : index
    %2 = vector.load %arg2[%c0_1, %c0_2] : memref<784x512xbf16, #tpu.memory_space<vmem>>, vector<784x512xbf16>
    %cst = arith.constant dense<0.000000e+00> : vector<8x512xf32>
    %3 = tpu.matmul %1, %2, %cst {dimension_numbers = #tpu.dot_dimension_numbers<[1], [0], [0], [1], [0, 0, 1, 1], [], []>} : vector<8x784xbf16>, vector<784x512xbf16>, vector<8x512xf32> -> vector<8x512xf32>
    %c0_3 = arith.constant 0 : index
    %c0_4 = arith.constant 0 : index
    %4 = vector.load %arg3[%c0_3, %c0_4] : memref<1x512xf32, #tpu.memory_space<vmem>>, vector<1x512xf32>
    %5 = vector.broadcast %4 : vector<1x512xf32> to vector<8x512xf32>
    %6 = arith.addf %3, %5 : vector<8x512xf32>
    %cst_5 = arith.constant 2.000000e-01 : f32
    %7 = vector.broadcast %cst_5 : f32 to vector<8x512xf32>
    %8 = arith.mulf %7, %6 : vector<8x512xf32>
    %9 = arith.maximumf %6, %8 : vector<8x512xf32>
    %10 = arith.truncf %9 : vector<8x512xf32> to vector<8x512xbf16>
    %c0_6 = arith.constant 0 : index
    %c0_7 = arith.constant 0 : index
    %11 = vector.load %arg4[%c0_6, %c0_7] : memref<512x256xbf16, #tpu.memory_space<vmem>>, vector<512x256xbf16>
    %cst_8 = arith.constant dense<0.000000e+00> : vector<8x256xf32>
    %12 = tpu.matmul %10, %11, %cst_8 {dimension_numbers = #tpu.dot_dimension_numbers<[1], [0], [0], [1], [0, 0, 1, 1], [], []>} : vector<8x512xbf16>, vector<512x256xbf16>, vector<8x256xf32> -> vector<8x256xf32>
    %c0_9 = arith.constant 0 : index
    %c0_10 = arith.constant 0 : index
    %13 = vector.load %arg5[%c0_9, %c0_10] : memref<1x256xf32, #tpu.memory_space<vmem>>, vector<1x256xf32>
    %14 = vector.broadcast %13 : vector<1x256xf32> to vector<8x256xf32>
    %15 = arith.addf %12, %14 : vector<8x256xf32>
    %cst_11 = arith.constant 2.000000e-01 : f32
    %16 = vector.broadcast %cst_11 : f32 to vector<8x256xf32>
    %17 = arith.mulf %16, %15 : vector<8x256xf32>
    %18 = arith.maximumf %15, %17 : vector<8x256xf32>
    %19 = arith.truncf %18 : vector<8x256xf32> to vector<8x256xbf16>
    %c0_12 = arith.constant 0 : index
    %c0_13 = arith.constant 0 : index
    %20 = vector.load %arg6[%c0_12, %c0_13] : memref<256x128xbf16, #tpu.memory_space<vmem>>, vector<256x128xbf16>
    %cst_14 = arith.constant dense<0.000000e+00> : vector<8x128xf32>
    %21 = tpu.matmul %19, %20, %cst_14 {dimension_numbers = #tpu.dot_dimension_numbers<[1], [0], [0], [1], [0, 0, 1, 1], [], []>} : vector<8x256xbf16>, vector<256x128xbf16>, vector<8x128xf32> -> vector<8x128xf32>
    %22 = vector.extract_strided_slice %21 {offsets = [0, 0], sizes = [8, 1], strides = [1, 1]} : vector<8x128xf32> to vector<8x1xf32>
    %c0_15 = arith.constant 0 : index
    %c0_16 = arith.constant 0 : index
    %23 = vector.load %arg7[%c0_15, %c0_16] : memref<1x1xf32, #tpu.memory_space<vmem>>, vector<1x1xf32>
    %24 = vector.broadcast %23 : vector<1x1xf32> to vector<8x1xf32>
    %25 = arith.addf %22, %24 : vector<8x1xf32>
    %26 = arith.negf %25 : vector<8x1xf32>
    %27 = math.exp %26 : vector<8x1xf32>
    %cst_17 = arith.constant 1.000000e+00 : f32
    %28 = vector.broadcast %cst_17 : f32 to vector<8x1xf32>
    %29 = arith.addf %28, %27 : vector<8x1xf32>
    %30 = arith.divf %28, %29 : vector<8x1xf32>
    %c0_18 = arith.constant 0 : index
    %c0_19 = arith.constant 0 : index
    %31 = vector.load %arg8[%c0_18, %c0_19] : memref<8x1xf32, #tpu.memory_space<vmem>>, vector<8x1xf32>
    tpu.vector_store %arg8[%c0_18, %c0_19], %30 {strides = array<i32>} : memref<8x1xf32, #tpu.memory_space<vmem>>, vector<8x1xf32>,
    return
  }
  func.func @transform_0(%arg0: i32) -> (i32, i32) {
    %c0_i32 = arith.constant 0 : i32
    %c0_i32_0 = arith.constant 0 : i32
    return %arg0, %c0_i32 : i32, i32
  }
  func.func @transform_1(%arg0: i32) -> (i32, i32) {
    %c0_i32 = arith.constant 0 : i32
    %c0_i32_0 = arith.constant 0 : i32
    %c0_i32_1 = arith.constant 0 : i32
    return %c0_i32, %c0_i32_0 : i32, i32
  }
  func.func @transform_2(%arg0: i32) -> (i32, i32) {
    %c0_i32 = arith.constant 0 : i32
    %c0_i32_0 = arith.constant 0 : i32
    %c0_i32_1 = arith.constant 0 : i32
    return %c0_i32, %c0_i32_0 : i32, i32
  }
  func.func @transform_3(%arg0: i32) -> (i32, i32) {
    %c0_i32 = arith.constant 0 : i32
    %c0_i32_0 = arith.constant 0 : i32
    %c0_i32_1 = arith.constant 0 : i32
    return %c0_i32, %c0_i32_0 : i32, i32
  }
  func.func @transform_4(%arg0: i32) -> (i32, i32) {
    %c0_i32 = arith.constant 0 : i32
    %c0_i32_0 = arith.constant 0 : i32
    %c0_i32_1 = arith.constant 0 : i32
    return %c0_i32, %c0_i32_0 : i32, i32
  }
  func.func @transform_5(%arg0: i32) -> (i32, i32) {
    %c0_i32 = arith.constant 0 : i32
    %c0_i32_0 = arith.constant 0 : i32
    %c0_i32_1 = arith.constant 0 : i32
    return %c0_i32, %c0_i32_0 : i32, i32
  }
  func.func @transform_6(%arg0: i32) -> (i32, i32) {
    %c0_i32 = arith.constant 0 : i32
    %c0_i32_0 = arith.constant 0 : i32
    %c0_i32_1 = arith.constant 0 : i32
    return %c0_i32, %c0_i32_0 : i32, i32
  }
  func.func @transform_7(%arg0: i32) -> (i32, i32) {
    %c0_i32 = arith.constant 0 : i32
    %c0_i32_0 = arith.constant 0 : i32
    return %arg0, %c0_i32 : i32, i32
  }
}

</mosaic_0001>

<bundles_post_ra>
// kernel: tpu_custom_call.1
= control target key start
LH: loop header
LB: loop body
LE: loop exit
PB: predicated region body
PF: predicated region fallthrough
CT: control target
= control target key end

     0   :  { %s3321_s0 = inlined_call_operand.hbm [shape: f32[8,784], index: 0, kind: input, shape index: {}]   ;;  %s3322_s1 = inlined_call_operand.hbm [shape: bf16[784,512], index: 1, kind: input, shape index: {}]   ;;  %s3323_s2 = inlined_call_operand.vmem [shape: f32[1,512], index: 2, kind: input, shape index: {}]   ;;  %s3324_s3 = inlined_call_operand.hbm [shape: bf16[512,256], index: 3, kind: input, shape index: {}]   ;;  %s3325_s4 = inlined_call_operand.vmem [shape: f32[1,256], index: 4, kind: input, shape index: {}]   ;;  %s3326_s5 = inlined_call_operand.hbm [shape: bf16[256,128], index: 5, kind: input, shape index: {}]   ;;  %s3327_s6 = inlined_call_operand.<no memory space> [shape: f32[1,1], index: 6, kind: input, shape index: {}]   ;;  %s3328_s7 = inlined_call_operand.vmem [shape: f32[8,1], index: 7, kind: output, shape index: {}]  }
   0x1   :  { %v12_v0 = vstv %s3327_s6 }
   0x2   :  { %13 = vst [vmem:[#allocation2] sm:$0x1] %v12_v0 }
   0x3   :  { %14 = vsyncpa [#allocation4], 0 }
   0x4   :  { %15 = vsyncpa [#allocation6], 0 }
   0x5   :  { %16 = vsyncpa [#allocation9], 0  ;;  %s3160_s26 = smov [#allocation5]   ;;  %s3066_s30 = scalar_lea.hbm %s3322_s1, 25088 }
   0x6   :  { %s32_s27 = sshll.u32 %s3160_s26, 4  ;;  %p3067_p0 = scmp.ne.s32.totalorder %s3322_s1, %s3066_s30  ;;  %s33_s27 = int_to_ptr.vmem [resolvable:$true] %s32_s27 }
   0x7   :  { %p3070_p1 = scmp.lt.u32.totalorder %s3066_s30, %s3322_s1 }
   0x9   :  { %p3072_p2 = pnand %p3070_p1, %p3067_p0 }
   0xb   :  { %3075 = shalt.err (!%p3072_p2)
}
   0xc   :  { %s3076_s6 = scalar_lea.vmem %s33_s27, 25088  ;;  %p3081_p4 = scmp.lt.s32.totalorder %s33_s27, %s33_s27 }
   0xd   :  { %p3077_p3 = scmp.ne.s32.totalorder %s33_s27, %s3076_s6  ;;  %p3082_p5 = scmp.lt.s32.totalorder %s3076_s6, %s3076_s6 }
   0xf   :  { %p3083_p6 = por %p3082_p5, %p3081_p4 }
  0x11   :  { %p3084_p7 = pnand %p3083_p6, %p3077_p3 }
  0x13   :  { %3087 = shalt.err (!%p3084_p7)
}
  0x14   :  { %s3161_s12 = smov 256   ;;  %s3162_s13 = smov 16  }
  0x15   :  { %38 = dma.hbm_to_vmem [thread:$0]  %s3322_s1, 25088, %s33_s27, [#allocation6], %s3161_s12, %s3161_s12, %s3162_s13  }
  0x16   :  { %s3163_s16 = smov [#allocation3]   ;;  %s3164_s18 = smov [#allocation7]  }
  0x17   :  { %s23_s17 = sshll.u32 %s3163_s16, 4  ;;  %s46_s19 = sshll.u32 %s3164_s18, 4  ;;  %s24_s17 = int_to_ptr.vmem [resolvable:$true] %s23_s17  ;;  %s47_s19 = int_to_ptr.vmem [resolvable:$true] %s46_s19 }
  0x18   :  { %s3088_s22 = scalar_lea.hbm %s3321_s0, 896 }
  0x19   :  { %p3089_p8 = scmp.ne.s32.totalorder %s3321_s0, %s3088_s22  ;;  %p3092_p9 = scmp.lt.u32.totalorder %s3088_s22, %s3321_s0 }
  0x1b   :  { %p3094_p10 = pnand %p3092_p9, %p3089_p8 }
  0x1d   :  { %3097 = shalt.err (!%p3094_p10)
}
  0x1e   :  { %s3098_s1 = scalar_lea.vmem %s24_s17, 896  ;;  %p3103_p12 = scmp.lt.s32.totalorder %s24_s17, %s24_s17 }
  0x1f   :  { %p3099_p11 = scmp.ne.s32.totalorder %s24_s17, %s3098_s1  ;;  %p3104_p13 = scmp.lt.s32.totalorder %s3098_s1, %s3098_s1 }
  0x21   :  { %p3105_p0 = por %p3104_p13, %p3103_p12 }
  0x23   :  { %p3106_p1 = pnand %p3105_p0, %p3099_p11 }
  0x25   :  { %3109 = shalt.err (!%p3106_p1)
}
  0x26   :  { %26 = dma.hbm_to_vmem [thread:$0]  %s3321_s0, 896, %s24_s17, [#allocation4]  }
  0x27   :  { %s3110_s8 = scalar_lea.hbm %s3324_s3, 8192 }
  0x28   :  { %p3111_p2 = scmp.ne.s32.totalorder %s3324_s3, %s3110_s8  ;;  %p3114_p3 = scmp.lt.u32.totalorder %s3110_s8, %s3324_s3 }
  0x2a   :  { %p3116_p4 = pnand %p3114_p3, %p3111_p2 }
  0x2c   :  { %3119 = shalt.err (!%p3116_p4)
}
  0x2d   :  { %s3120_s12 = scalar_lea.vmem %s47_s19, 8192  ;;  %p3125_p6 = scmp.lt.s32.totalorder %s47_s19, %s47_s19 }
  0x2e   :  { %p3121_p5 = scmp.ne.s32.totalorder %s47_s19, %s3120_s12  ;;  %p3126_p7 = scmp.lt.s32.totalorder %s3120_s12, %s3120_s12 }
  0x30   :  { %p3127_p8 = por %p3126_p7, %p3125_p6 }
  0x32   :  { %p3128_p9 = pnand %p3127_p8, %p3121_p5 }
  0x34   :  { %3131 = shalt.err (!%p3128_p9)
}
  0x35   :  { %s3165_s0 = smov 128   ;;  %s3166_s13 = smov 8  }
  0x36   :  { %52 = dma.hbm_to_vmem [thread:$0]  %s3324_s3, 8192, %s47_s19, [#allocation6], %s3165_s0, %s3165_s0, %s3166_s13  }
  0x37   :  { %s3167_s16 = smov [#allocation8]   ;;  %s3132_s21 = scalar_lea.hbm %s3326_s5, 2048 }
  0x38   :  { %s60_s17 = sshll.u32 %s3167_s16, 4  ;;  %p3133_p10 = scmp.ne.s32.totalorder %s3326_s5, %s3132_s21  ;;  %s61_s17 = int_to_ptr.vmem [resolvable:$true] %s60_s17 }
  0x39   :  { %p3136_p11 = scmp.lt.u32.totalorder %s3132_s21, %s3326_s5 }
  0x3b   :  { %p3138_p12 = pnand %p3136_p11, %p3133_p10 }
  0x3d   :  { %3141 = shalt.err (!%p3138_p12)
}
  0x3e   :  { %s3142_s26 = scalar_lea.vmem %s61_s17, 2048  ;;  %p3147_p0 = scmp.lt.s32.totalorder %s61_s17, %s61_s17 }
  0x3f   :  { %p3143_p13 = scmp.ne.s32.totalorder %s61_s17, %s3142_s26  ;;  %p3148_p1 = scmp.lt.s32.totalorder %s3142_s26, %s3142_s26 }
  0x41   :  { %p3149_p2 = por %p3148_p1, %p3147_p0 }
  0x43   :  { %p3150_p3 = pnand %p3149_p2, %p3143_p13 }
  0x45   :  { %3153 = shalt.err (!%p3150_p3)
}
  0x46   :  { %s3168_s3 = smov 64   ;;  %s3169_s19 = smov 4  }
  0x47   :  { %66 = dma.hbm_to_vmem [thread:$0]  %s3326_s5, 2048, %s61_s17, [#allocation9], %s3168_s3, %s3168_s3, %s3169_s19  }
  0x48   :  { %3154 = dma.done.wait [#allocation4], 896  }
  0x49   :  { %3155 = vsyncadd [#allocation4], 4294966400 }
  0x4a   :  { %3156 = dma.done.wait [#allocation6], 33280  }
  0x4b   :  { %3157 = vsyncadd [#allocation6], 4294934016 }
  0x4c   :  { %3158 = dma.done.wait [#allocation9], 2048  }
  0x4d   :  { %3159 = vsyncadd [#allocation9], 4294965248  ;;  %v2656_v1 = vld [vmem:[#allocation5 + $0x4] ss:$16 sps:$4 sm:$0xff]   ;;  %v2660_v3 = vld [vmem:[#allocation5] ss:$16 sps:$4 sm:$0xff]  }
  0x4e   :  { %v2658_v2 = vld [vmem:[#allocation5 + $0x204] ss:$16 sps:$4 sm:$0xff]   ;;  %1298 = vmatprep.subr.bf16.mxu1 %v2656_v1  ;;  %v2661_v4 = vld [vmem:[#allocation5 + $0x200] ss:$16 sps:$4 sm:$0xff]   ;;  %vm1294_vm0 = vcmask 130048   ;;  %vm2304_vm1 = vcmask 7168  }
  0x4f   :  { %1339 = vmatprep.subr.bf16.mxu0 %v2658_v2  ;;  %v2662_v5 = vld [vmem:[#allocation5 + $0x24] ss:$16 sps:$4 sm:$0xff]   ;;  %1299 = vmatpush1.bf16.msra.mxu1 %v2660_v3  ;;  %v2666_v7 = vld [vmem:[#allocation5 + $0x20] ss:$16 sps:$4 sm:$0xff]  }
  0x50   :  { %1340 = vmatpush1.bf16.msra.mxu0 %v2661_v4  ;;  %v2664_v6 = vld [vmem:[#allocation5 + $0x224] ss:$16 sps:$4 sm:$0xff]   ;;  %1300 = vmatprep.subr.bf16.mxu1 %v2662_v5  ;;  %v2667_v8 = vld [vmem:[#allocation5 + $0x220] ss:$16 sps:$4 sm:$0xff]   ;;  %v82_v5 = vld [vmem:[#allocation3] sm:$0xff] }
  0x51   :  { %1341 = vmatprep.subr.bf16.mxu0 %v2664_v6  ;;  %v2668_v9 = vld [vmem:[#allocation5 + $0x44] ss:$16 sps:$4 sm:$0xff]   ;;  %v2672_v11 = vld [vmem:[#allocation5 + $0x40] ss:$16 sps:$4 sm:$0xff]  }
  0x52   :  { %v2670_v10 = vld [vmem:[#allocation5 + $0x244] ss:$16 sps:$4 sm:$0xff]   ;;  %v2673_v12 = vld [vmem:[#allocation5 + $0x240] ss:$16 sps:$4 sm:$0xff]  }
  0x53   :  { %1301 = vmatpush1.bf16.msra.mxu1 %v2666_v7  ;;  %v2674_v13 = vld [vmem:[#allocation5 + $0x64] ss:$16 sps:$4 sm:$0xff]   ;;  %v2678_v15 = vld [vmem:[#allocation5 + $0x60] ss:$16 sps:$4 sm:$0xff]   ;;  %v84_v7 = vld [vmem:[#allocation3 + $0x10] sm:$0xff] }
  0x54   :  { %1342 = vmatpush1.bf16.msra.mxu0 %v2667_v8  ;;  %1302 = vmatprep.subr.bf16.mxu1 %v2668_v9  ;;  %v2676_v14 = vld [vmem:[#allocation5 + $0x264] ss:$16 sps:$4 sm:$0xff]   ;;  %v2679_v16 = vld [vmem:[#allocation5 + $0x260] ss:$16 sps:$4 sm:$0xff]   ;;  %v2757_v8 = vld [vmem:[#allocation5 + $0xc] ss:$16 sps:$4 sm:$0xff]   ;;  %v3268_v9 = vpack.c.bf16 %v82_v5, %v82_v5 }
  0x55   :  { %1343 = vmatprep.subr.bf16.mxu0 %v2670_v10  ;;  %v2680_v17 = vld [vmem:[#allocation5 + $0x84] ss:$16 sps:$4 sm:$0xff]   ;;  %v2684_v19 = vld [vmem:[#allocation5 + $0x80] ss:$16 sps:$4 sm:$0xff]   ;;  %v2841_v5 = vld [vmem:[#allocation5 + $0x1cc] ss:$16 sps:$4 sm:$0xff]  }
  0x56   :  { %v2682_v18 = vld [vmem:[#allocation5 + $0x284] ss:$16 sps:$4 sm:$0xff]   ;;  %v2685_v20 = vld [vmem:[#allocation5 + $0x280] ss:$16 sps:$4 sm:$0xff]  }
  0x57   :  { %1303 = vmatpush1.bf16.msra.mxu1 %v2672_v11  ;;  %v2686_v21 = vld [vmem:[#allocation5 + $0xa4] ss:$16 sps:$4 sm:$0xff]   ;;  %v2690_v23 = vld [vmem:[#allocation5 + $0xa0] ss:$16 sps:$4 sm:$0xff]   ;;  %v2755_v11 = vld [vmem:[#allocation5 + $0x8] ss:$16 sps:$4 sm:$0xff]  }
  0x58   :  { %1344 = vmatpush1.bf16.msra.mxu0 %v2673_v12  ;;  %1304 = vmatprep.subr.bf16.mxu1 %v2674_v13  ;;  %v2688_v22 = vld [vmem:[#allocation5 + $0x2a4] ss:$16 sps:$4 sm:$0xff]   ;;  %v2691_v24 = vld [vmem:[#allocation5 + $0x2a0] ss:$16 sps:$4 sm:$0xff]   ;;  %v3270_v12 = vpack.c.bf16 %v84_v7, %v84_v7  ;;  %v2839_v7 = vld [vmem:[#allocation5 + $0x1c8] ss:$16 sps:$4 sm:$0xff]  }
  0x59   :  { %1345 = vmatprep.subr.bf16.mxu0 %v2676_v14  ;;  %v2692_v25 = vld [vmem:[#allocation5 + $0xc4] ss:$16 sps:$4 sm:$0xff]   ;;  %v2696_v27 = vld [vmem:[#allocation5 + $0xc0] ss:$16 sps:$4 sm:$0xff]   ;;  %v2763_v14 = vld [vmem:[#allocation5 + $0x2c] ss:$16 sps:$4 sm:$0xff]  }
  0x5a   :  { %v2694_v26 = vld [vmem:[#allocation5 + $0x2c4] ss:$16 sps:$4 sm:$0xff]   ;;  %v2697_v28 = vld [vmem:[#allocation5 + $0x2c0] ss:$16 sps:$4 sm:$0xff]  }
  0x5b   :  { %1305 = vmatpush1.bf16.msra.mxu1 %v2678_v15  ;;  %v2698_v29 = vld [vmem:[#allocation5 + $0xe4] ss:$16 sps:$4 sm:$0xff]   ;;  %v2702_v31 = vld [vmem:[#allocation5 + $0xe0] ss:$16 sps:$4 sm:$0xff]  }
  0x5c   :  { %1346 = vmatpush1.bf16.msra.mxu0 %v2679_v16  ;;  %1306 = vmatprep.subr.bf16.mxu1 %v2680_v17  ;;  %v2700_v30 = vld [vmem:[#allocation5 + $0x2e4] ss:$16 sps:$4 sm:$0xff]   ;;  %v2703_v32 = vld [vmem:[#allocation5 + $0x2e0] ss:$16 sps:$4 sm:$0xff]   ;;  %v2761_v16 = vld [vmem:[#allocation5 + $0x28] ss:$16 sps:$4 sm:$0xff]  }
  0x5d   :  { %1347 = vmatprep.subr.bf16.mxu0 %v2682_v18  ;;  %v2704_v33 = vld [vmem:[#allocation5 + $0x104] ss:$16 sps:$4 sm:$0xff]   ;;  %v2708_v35 = vld [vmem:[#allocation5 + $0x100] ss:$16 sps:$4 sm:$0xff]   ;;  %v2769_v18 = vld [vmem:[#allocation5 + $0x4c] ss:$16 sps:$4 sm:$0xff]  }
  0x5e   :  { %v2706_v34 = vld [vmem:[#allocation5 + $0x304] ss:$16 sps:$4 sm:$0xff]   ;;  %v2709_v36 = vld [vmem:[#allocation5 + $0x300] ss:$16 sps:$4 sm:$0xff]  }
  0x5f   :  { %1307 = vmatpush1.bf16.msra.mxu1 %v2684_v19  ;;  %v2710_v37 = vld [vmem:[#allocation5 + $0x124] ss:$16 sps:$4 sm:$0xff]   ;;  %v2714_v39 = vld [vmem:[#allocation5 + $0x120] ss:$16 sps:$4 sm:$0xff]  }
  0x60   :  { %1348 = vmatpush1.bf16.msra.mxu0 %v2685_v20  ;;  %1308 = vmatprep.subr.bf16.mxu1 %v2686_v21  ;;  %v2712_v38 = vld [vmem:[#allocation5 + $0x324] ss:$16 sps:$4 sm:$0xff]   ;;  %v2715_v40 = vld [vmem:[#allocation5 + $0x320] ss:$16 sps:$4 sm:$0xff]   ;;  %v2767_v20 = vld [vmem:[#allocation5 + $0x48] ss:$16 sps:$4 sm:$0xff]  }
  0x61   :  { %1349 = vmatprep.subr.bf16.mxu0 %v2688_v22  ;;  %v2716_v41 = vld [vmem:[#allocation5 + $0x144] ss:$16 sps:$4 sm:$0xff]   ;;  %v2720_v43 = vld [vmem:[#allocation5 + $0x140] ss:$16 sps:$4 sm:$0xff]   ;;  %v2775_v22 = vld [vmem:[#allocation5 + $0x6c] ss:$16 sps:$4 sm:$0xff]  }
  0x62   :  { %v2718_v42 = vld [vmem:[#allocation5 + $0x344] ss:$16 sps:$4 sm:$0xff]   ;;  %v2721_v44 = vld [vmem:[#allocation5 + $0x340] ss:$16 sps:$4 sm:$0xff]  }
  0x63   :  { %1309 = vmatpush1.bf16.msra.mxu1 %v2690_v23  ;;  %v2722_v45 = vld [vmem:[#allocation5 + $0x164] ss:$16 sps:$4 sm:$0xff]   ;;  %v2726_v48 = vld [vmem:[#allocation5 + $0x160] ss:$16 sps:$4 sm:$0xff]  }
  0x64   :  { %1350 = vmatpush1.bf16.msra.mxu0 %v2691_v24  ;;  %1310 = vmatprep.subr.bf16.mxu1 %v2692_v25  ;;  %v2724_v46 = vld [vmem:[#allocation5 + $0x364] ss:$16 sps:$4 sm:$0xff]   ;;  %v2727_v51 = vld [vmem:[#allocation5 + $0x360] ss:$16 sps:$4 sm:$0xff]   ;;  %v2773_v24 = vld [vmem:[#allocation5 + $0x68] ss:$16 sps:$4 sm:$0xff]  }
  0x65   :  { %1351 = vmatprep.subr.bf16.mxu0 %v2694_v26  ;;  %v83_v47 = vld [vmem:[#allocation3 + $0x8] sm:$0xff]  ;;  %v85_v50 = vld [vmem:[#allocation3 + $0x18] sm:$0xff]  ;;  %v2781_v26 = vld [vmem:[#allocation5 + $0x8c] ss:$16 sps:$4 sm:$0xff]  }
  0x66   :  { %v3262_v49 = vpack.c.bf16 %v83_v47, %v83_v47  ;;  %v2728_v52 = vld [vmem:[#allocation5 + $0x184] ss:$16 sps:$4 sm:$0xff]   ;;  %v3264_v53 = vpack.c.bf16 %v85_v50, %v85_v50  ;;  %v2732_v55 = vld [vmem:[#allocation5 + $0x180] ss:$16 sps:$4 sm:$0xff]   ;;  %v2809_v50 = vld [vmem:[#allocation5 + $0x128] ss:$16 sps:$4 sm:$0xff]  }
  0x67   :  { %1311 = vmatpush1.bf16.msra.mxu1 %v2696_v27  ;;  %v2730_v54 = vld [vmem:[#allocation5 + $0x384] ss:$16 sps:$4 sm:$0xff]   ;;  %v2733_v56 = vld [vmem:[#allocation5 + $0x380] ss:$16 sps:$4 sm:$0xff]  }
  0x68   :  { %1352 = vmatpush1.bf16.msra.mxu0 %v2697_v28  ;;  %1312 = vmatprep.subr.bf16.mxu1 %v2698_v29  ;;  %v2734_v57 = vld [vmem:[#allocation5 + $0x1a4] ss:$16 sps:$4 sm:$0xff]   ;;  %v2738_v59 = vld [vmem:[#allocation5 + $0x1a0] ss:$16 sps:$4 sm:$0xff]   ;;  %v2779_v28 = vld [vmem:[#allocation5 + $0x88] ss:$16 sps:$4 sm:$0xff]  }
  0x69   :  { %1353 = vmatprep.subr.bf16.mxu0 %v2700_v30  ;;  %1330 = vmatprep.mubr.bf16.mxu1 %v3262_v49  ;;  %v2736_v58 = vld [vmem:[#allocation5 + $0x3a4] ss:$16 sps:$4 sm:$0xff]   ;;  %v2739_v60 = vld [vmem:[#allocation5 + $0x3a0] ss:$16 sps:$4 sm:$0xff]   ;;  %v2787_v30 = vld [vmem:[#allocation5 + $0xac] ss:$16 sps:$4 sm:$0xff]  }
  0x6a   :  { %1371 = vmatprep.mubr.bf16.mxu0 %v3264_v53  ;;  %v2740_v61 = vld [vmem:[#allocation5 + $0x1c4] ss:$16 sps:$4 sm:$0xff]   ;;  %v2744_v63 = vld [vmem:[#allocation5 + $0x1c0] ss:$16 sps:$4 sm:$0xff]  }
  0x6b   :  { %1313 = vmatpush1.bf16.msra.mxu1 %v2702_v31  ;;  %v2742_v62 = vld [vmem:[#allocation5 + $0x3c4] ss:$16 sps:$4 sm:$0xff]   ;;  %v2745_v0 = vld [vmem:[#allocation5 + $0x3c0] ss:$16 sps:$4 sm:$0xff]  }
  0x6c   :  { %1354 = vmatpush1.bf16.msra.mxu0 %v2703_v32  ;;  %1314 = vmatprep.subr.bf16.mxu1 %v2704_v33  ;;  %v2746_v1 = vld [vmem:[#allocation5 + $0x1e4] ss:$16 sps:$4 sm:$0xff]   ;;  %v2750_v3 = vld [vmem:[#allocation5 + $0x1e0] ss:$16 sps:$4 sm:$0xff]   ;;  %v2785_v32 = vld [vmem:[#allocation5 + $0xa8] ss:$16 sps:$4 sm:$0xff]  }
  0x6d   :  { %1355 = vmatprep.subr.bf16.mxu0 %v2706_v34  ;;  %v2748_v2 = vld [vmem:[#allocation5 + $0x3e4] ss:$16 sps:$4 sm:$0xff]   ;;  %v2751_v4 = vld [vmem:[#allocation5 + $0x3e0] ss:$16 sps:$4 sm:$0xff]   ;;  %v2793_v34 = vld [vmem:[#allocation5 + $0xcc] ss:$16 sps:$4 sm:$0xff]  }
  0x6e   :  { %v2754_v6 = vld [vmem:[#allocation5 + $0x404] ss:$16 sps:$4 sm:$0xff]   ;;  %v2752_v10 = vld [vmem:[#allocation5 + $0x400] ss:$16 sps:$4 sm:$0xff]  }
  0x6f   :  { %1315 = vmatpush1.bf16.msra.mxu1 %v2708_v35  ;;  %v2760_v13 = vld [vmem:[#allocation5 + $0x424] ss:$16 sps:$4 sm:$0xff]   ;;  %v2758_v15 = vld [vmem:[#allocation5 + $0x420] ss:$16 sps:$4 sm:$0xff]  }
  0x70   :  { %1356 = vmatpush1.bf16.msra.mxu0 %v2709_v36  ;;  %1316 = vmatprep.subr.bf16.mxu1 %v2710_v37  ;;  %v2766_v17 = vld [vmem:[#allocation5 + $0x444] ss:$16 sps:$4 sm:$0xff]   ;;  %v2764_v19 = vld [vmem:[#allocation5 + $0x440] ss:$16 sps:$4 sm:$0xff]  }
  0x71   :  { %1357 = vmatprep.subr.bf16.mxu0 %v2712_v38  ;;  %v2772_v21 = vld [vmem:[#allocation5 + $0x464] ss:$16 sps:$4 sm:$0xff]   ;;  %v2770_v23 = vld [vmem:[#allocation5 + $0x460] ss:$16 sps:$4 sm:$0xff]   ;;  %v2791_v38 = vld [vmem:[#allocation5 + $0xc8] ss:$16 sps:$4 sm:$0xff]  }
  0x72   :  { %v2778_v25 = vld [vmem:[#allocation5 + $0x484] ss:$16 sps:$4 sm:$0xff]   ;;  %v2776_v27 = vld [vmem:[#allocation5 + $0x480] ss:$16 sps:$4 sm:$0xff]  }
  0x73   :  { %1317 = vmatpush1.bf16.msra.mxu1 %v2714_v39  ;;  %v2784_v29 = vld [vmem:[#allocation5 + $0x4a4] ss:$16 sps:$4 sm:$0xff]   ;;  %v2782_v31 = vld [vmem:[#allocation5 + $0x4a0] ss:$16 sps:$4 sm:$0xff]  }
  0x74   :  { %1358 = vmatpush1.bf16.msra.mxu0 %v2715_v40  ;;  %1318 = vmatprep.subr.bf16.mxu1 %v2716_v41  ;;  %v2790_v33 = vld [vmem:[#allocation5 + $0x4c4] ss:$16 sps:$4 sm:$0xff]   ;;  %v2788_v37 = vld [vmem:[#allocation5 + $0x4c0] ss:$16 sps:$4 sm:$0xff]   ;;  %v2799_v40 = vld [vmem:[#allocation5 + $0xec] ss:$16 sps:$4 sm:$0xff]  }
  0x75   :  { %1359 = vmatprep.subr.bf16.mxu0 %v2718_v42  ;;  %v87_v35 = vld [vmem:[#allocation3 + $0x28] sm:$0xff]  ;;  %v2797_v42 = vld [vmem:[#allocation5 + $0xe8] ss:$16 sps:$4 sm:$0xff]  }
  0x76   :  { %v3275_v36 = vpack.c.bf16 %v87_v35, %v87_v35  ;;  %v2796_v39 = vld [vmem:[#allocation5 + $0x4e4] ss:$16 sps:$4 sm:$0xff]   ;;  %v2794_v41 = vld [vmem:[#allocation5 + $0x4e0] ss:$16 sps:$4 sm:$0xff]   ;;  %v2874_v35 = vld [vmem:[#allocation5 + $0x2ec] ss:$16 sps:$4 sm:$0xff]  }
  0x77   :  { %1319 = vmatpush1.bf16.msra.mxu1 %v2720_v43  ;;  %v2802_v43 = vld [vmem:[#allocation5 + $0x504] ss:$16 sps:$4 sm:$0xff]  }
  0x78   :  { %1360 = vmatpush1.bf16.msra.mxu0 %v2721_v44  ;;  %1320 = vmatprep.subr.bf16.mxu1 %v2722_v45  ;;  %v2805_v44 = vld [vmem:[#allocation5 + $0x10c] ss:$16 sps:$4 sm:$0xff]   ;;  %v2800_v45 = vld [vmem:[#allocation5 + $0x500] ss:$16 sps:$4 sm:$0xff]   ;;  %v2808_v47 = vld [vmem:[#allocation5 + $0x524] ss:$16 sps:$4 sm:$0xff]  }
  0x79   :  { %1361 = vmatprep.subr.bf16.mxu0 %v2724_v46  ;;  %v2803_v46 = vld [vmem:[#allocation5 + $0x108] ss:$16 sps:$4 sm:$0xff]  }
  0x7b   :  { %1321 = vmatpush1.bf16.msra.mxu1 %v2726_v48  ;;  %v2811_v48 = vld [vmem:[#allocation5 + $0x12c] ss:$16 sps:$4 sm:$0xff]  }
  0x7c   :  { %1362 = vmatpush1.bf16.msra.mxu0 %v2727_v51  ;;  %1322 = vmatprep.subr.bf16.mxu1 %v2728_v52  ;;  %v2814_v51 = vld [vmem:[#allocation5 + $0x544] ss:$16 sps:$4 sm:$0xff]   ;;  %v2817_v52 = vld [vmem:[#allocation5 + $0x14c] ss:$16 sps:$4 sm:$0xff]  }
  0x7d   :  { %1363 = vmatprep.subr.bf16.mxu0 %v2730_v54  ;;  %v2812_v54 = vld [vmem:[#allocation5 + $0x540] ss:$16 sps:$4 sm:$0xff]  }
  0x7f   :  { %1323 = vmatpush1.bf16.msra.mxu1 %v2732_v55  ;;  %v2815_v55 = vld [vmem:[#allocation5 + $0x148] ss:$16 sps:$4 sm:$0xff]  }
  0x80   :  { %1364 = vmatpush1.bf16.msra.mxu0 %v2733_v56  ;;  %1324 = vmatprep.subr.bf16.mxu1 %v2734_v57  ;;  %v2820_v56 = vld [vmem:[#allocation5 + $0x564] ss:$16 sps:$4 sm:$0xff]   ;;  %v2823_v57 = vld [vmem:[#allocation5 + $0x16c] ss:$16 sps:$4 sm:$0xff]  }
  0x81   :  { %1365 = vmatprep.subr.bf16.mxu0 %v2736_v58  ;;  %v2818_v58 = vld [vmem:[#allocation5 + $0x560] ss:$16 sps:$4 sm:$0xff]  }
  0x83   :  { %1325 = vmatpush1.bf16.msra.mxu1 %v2738_v59  ;;  %v2821_v59 = vld [vmem:[#allocation5 + $0x168] ss:$16 sps:$4 sm:$0xff]  }
  0x84   :  { %1366 = vmatpush1.bf16.msra.mxu0 %v2739_v60  ;;  %1326 = vmatprep.subr.bf16.mxu1 %v2740_v61  ;;  %v2826_v60 = vld [vmem:[#allocation5 + $0x584] ss:$16 sps:$4 sm:$0xff]   ;;  %v2829_v61 = vld [vmem:[#allocation5 + $0x18c] ss:$16 sps:$4 sm:$0xff]  }
  0x85   :  { %1367 = vmatprep.subr.bf16.mxu0 %v2742_v62  ;;  %v2824_v62 = vld [vmem:[#allocation5 + $0x580] ss:$16 sps:$4 sm:$0xff]  }
  0x87   :  { %1327 = vmatpush1.bf16.msra.mxu1 %v2744_v63  ;;  %v2827_v63 = vld [vmem:[#allocation5 + $0x188] ss:$16 sps:$4 sm:$0xff]  }
  0x88   :  { %1368 = vmatpush1.bf16.msra.mxu0 %v2745_v0  ;;  %1328 = vmatprep.subr.bf16.mxu1 %v2746_v1  ;;  %v2832_v0 = vld [vmem:[#allocation5 + $0x5a4] ss:$16 sps:$4 sm:$0xff]   ;;  %v2835_v1 = vld [vmem:[#allocation5 + $0x1ac] ss:$16 sps:$4 sm:$0xff]  }
  0x89   :  { %1369 = vmatprep.subr.bf16.mxu0 %v2748_v2  ;;  %v2830_v2 = vld [vmem:[#allocation5 + $0x5a0] ss:$16 sps:$4 sm:$0xff]  }
  0x8b   :  { %1329 = vmatpush1.bf16.msra.mxu1 %v2750_v3  ;;  %v2833_v3 = vld [vmem:[#allocation5 + $0x1a8] ss:$16 sps:$4 sm:$0xff]  }
  0x8c   :  { %1370 = vmatpush1.bf16.msra.mxu0 %v2751_v4  ;;  %1462 = vmatprep.subr.bf16.mxu1 %v2757_v8  ;;  %v2838_v4 = vld [vmem:[#allocation5 + $0x5c4] ss:$16 sps:$4 sm:$0xff]  }
  0x8d   :  { %1380 = vmatprep.subr.bf16.mxu0 %v2754_v6  ;;  %v2836_v6 = vld [vmem:[#allocation5 + $0x5c0] ss:$16 sps:$4 sm:$0xff]   ;;  %v2844_v8 = vld [vmem:[#allocation5 + $0x5e4] ss:$16 sps:$4 sm:$0xff]  }
  0x8e   :  { %1331 = vmatmul.mubr.bf16.vlgmr.msra.gmra.mrb[0].mxu1 %v3268_v9 }
  0x8f   :  { %1372 = vmatmul.mubr.bf16.vlgmr.msra.gmra.mrb[0].mxu0 %v3270_v12  ;;  %1463 = vmatpush1.bf16.msra.mxu1 %v2755_v11  ;;  %v2842_v11 = vld [vmem:[#allocation5 + $0x5e0] ss:$16 sps:$4 sm:$0xff]  }
  0x90   :  { %1381 = vmatpush1.bf16.msra.mxu0 %v2752_v10  ;;  %1464 = vmatprep.subr.bf16.mxu1 %v2763_v14  ;;  %v2847_v10 = vld [vmem:[#allocation5 + $0x1ec] ss:$16 sps:$4 sm:$0xff]  }
  0x91   :  { %1382 = vmatprep.subr.bf16.mxu0 %v2760_v13  ;;  %1494 = vmatprep.mubr.bf16.mxu1 %v3262_v49  ;;  %v2806_v49 = vld [vmem:[#allocation5 + $0x520] ss:$16 sps:$4 sm:$0xff]   ;;  %v2845_v13 = vld [vmem:[#allocation5 + $0x1e8] ss:$16 sps:$4 sm:$0xff]  }
  0x92   :  { %1412 = vmatprep.mubr.bf16.mxu0 %v3275_v36  ;;  %v86_v14 = vld [vmem:[#allocation3 + $0x20] sm:$0xff] }
  0x93   :  { %1465 = vmatpush1.bf16.msra.mxu1 %v2761_v16  ;;  %v2856_v16 = vld [vmem:[#allocation5 + $0x604] ss:$16 sps:$4 sm:$0xff]  }
  0x94   :  { %1383 = vmatpush1.bf16.msra.mxu0 %v2758_v15  ;;  %1466 = vmatprep.subr.bf16.mxu1 %v2769_v18  ;;  %v2850_v15 = vld [vmem:[#allocation5 + $0x20c] ss:$16 sps:$4 sm:$0xff]   ;;  %v2848_v18 = vld [vmem:[#allocation5 + $0x208] ss:$16 sps:$4 sm:$0xff]  }
  0x95   :  { %1384 = vmatprep.subr.bf16.mxu0 %v2766_v17  ;;  %v3278_v17 = vpack.c.bf16 %v86_v14, %v86_v14  ;;  %v2982_v14 = vld [vmem:[#allocation7 + $0xa4] ss:$8 sps:$4 sm:$0xff]  }
  0x97   :  { %1467 = vmatpush1.bf16.msra.mxu1 %v2767_v20  ;;  %v2853_v20 = vld [vmem:[#allocation5 + $0x22c] ss:$16 sps:$4 sm:$0xff]  }
  0x98   :  { %1385 = vmatpush1.bf16.msra.mxu0 %v2764_v19  ;;  %1468 = vmatprep.subr.bf16.mxu1 %v2775_v22  ;;  %v2854_v19 = vld [vmem:[#allocation5 + $0x600] ss:$16 sps:$4 sm:$0xff]   ;;  %v2851_v22 = vld [vmem:[#allocation5 + $0x228] ss:$16 sps:$4 sm:$0xff]  }
  0x99   :  { %1386 = vmatprep.subr.bf16.mxu0 %v2772_v21  ;;  %v2946_v21 = vld [vmem:[#allocation5 + $0x60c] ss:$16 sps:$4 sm:$0xff]  }
  0x9b   :  { %1469 = vmatpush1.bf16.msra.mxu1 %v2773_v24  ;;  %v3170_v24 = vmov 0  }
  0x9c   :  { %1387 = vmatpush1.bf16.msra.mxu0 %v2770_v23  ;;  %1470 = vmatprep.subr.bf16.mxu1 %v2781_v26  ;;  %v2859_v23 = vld [vmem:[#allocation5 + $0x24c] ss:$16 sps:$4 sm:$0xff]  }
  0x9d   :  { %1388 = vmatprep.subr.bf16.mxu0 %v2778_v25  ;;  %v2857_v25 = vld [vmem:[#allocation5 + $0x248] ss:$16 sps:$4 sm:$0xff]  }
  0x9e   :  { %v88_v26 = vld [vmem:[#allocation3 + $0x30] sm:$0xff] }
  0x9f   :  { %1471 = vmatpush1.bf16.msra.mxu1 %v2779_v28  ;;  %v2860_v28 = vld [vmem:[#allocation5 + $0x268] ss:$16 sps:$4 sm:$0xff]  }
  0xa0   :  { %1389 = vmatpush1.bf16.msra.mxu0 %v2776_v27  ;;  %1472 = vmatprep.subr.bf16.mxu1 %v2787_v30  ;;  %v2862_v27 = vld [vmem:[#allocation5 + $0x26c] ss:$16 sps:$4 sm:$0xff]   ;;  %v95_v30 = vpack.c.bf16 %v88_v26, %v88_v26  ;;  %v2986_v26 = vld [vmem:[#allocation7 + $0xc0] ss:$8 sps:$4 sm:$0xff]  }
  0xa1   :  { %1390 = vmatprep.subr.bf16.mxu0 %v2784_v29  ;;  %v2944_v29 = vld [vmem:[#allocation5 + $0x608] ss:$16 sps:$4 sm:$0xff]  }
  0xa3   :  { %1473 = vmatpush1.bf16.msra.mxu1 %v2785_v32  ;;  %v2868_v32 = vld [vmem:[#allocation5 + $0x2ac] ss:$16 sps:$4 sm:$0xff]  }
  0xa4   :  { %1391 = vmatpush1.bf16.msra.mxu0 %v2782_v31  ;;  %1474 = vmatprep.subr.bf16.mxu1 %v2793_v34  ;;  %v2863_v31 = vld [vmem:[#allocation5 + $0x288] ss:$16 sps:$4 sm:$0xff]  }
  0xa5   :  { %1392 = vmatprep.subr.bf16.mxu0 %v2790_v33  ;;  %v2866_v33 = vld [vmem:[#allocation5 + $0x2a8] ss:$16 sps:$4 sm:$0xff]  }
  0xa6   :  { %v2869_v34 = vld [vmem:[#allocation5 + $0x2c8] ss:$16 sps:$4 sm:$0xff]  }
  0xa7   :  { %1475 = vmatpush1.bf16.msra.mxu1 %v2791_v38  ;;  %v2952_v38 = vld [vmem:[#allocation7 + $0x4] ss:$8 sps:$4 sm:$0xff]  }
  0xa8   :  { %1393 = vmatpush1.bf16.msra.mxu0 %v2788_v37  ;;  %1476 = vmatprep.subr.bf16.mxu1 %v2799_v40  ;;  %v2950_v37 = vld [vmem:[#allocation7] ss:$8 sps:$4 sm:$0xff]  }
  0xa9   :  { %1394 = vmatprep.subr.bf16.mxu0 %v2796_v39  ;;  %v2955_v39 = vld [vmem:[#allocation7 + $0x14] ss:$8 sps:$4 sm:$0xff]   ;;  %v2872_v40 = vld [vmem:[#allocation5 + $0x2e8] ss:$16 sps:$4 sm:$0xff]  }
  0xab   :  { %1477 = vmatpush1.bf16.msra.mxu1 %v2797_v42  ;;  %v2877_v42 = vld [vmem:[#allocation5 + $0x30c] ss:$16 sps:$4 sm:$0xff]  }
  0xac   :  { %1395 = vmatpush1.bf16.msra.mxu0 %v2794_v41  ;;  %1478 = vmatprep.subr.bf16.mxu1 %v2805_v44  ;;  %v2953_v41 = vld [vmem:[#allocation7 + $0x10] ss:$8 sps:$4 sm:$0xff]  }
  0xad   :  { %1396 = vmatprep.subr.bf16.mxu0 %v2802_v43  ;;  %v2958_v43 = vld [vmem:[#allocation7 + $0x24] ss:$8 sps:$4 sm:$0xff]   ;;  %v2875_v44 = vld [vmem:[#allocation5 + $0x308] ss:$16 sps:$4 sm:$0xff]  }
  0xaf   :  { %1479 = vmatpush1.bf16.msra.mxu1 %v2803_v46  ;;  %v2880_v46 = vld [vmem:[#allocation5 + $0x32c] ss:$16 sps:$4 sm:$0xff]  }
  0xb0   :  { %1397 = vmatpush1.bf16.msra.mxu0 %v2800_v45  ;;  %1480 = vmatprep.subr.bf16.mxu1 %v2811_v48  ;;  %v2956_v45 = vld [vmem:[#allocation7 + $0x20] ss:$8 sps:$4 sm:$0xff]  }
  0xb1   :  { %1398 = vmatprep.subr.bf16.mxu0 %v2808_v47  ;;  %v2961_v47 = vld [vmem:[#allocation7 + $0x34] ss:$8 sps:$4 sm:$0xff]   ;;  %v2878_v48 = vld [vmem:[#allocation5 + $0x328] ss:$16 sps:$4 sm:$0xff]  }
  0xb3   :  { %1481 = vmatpush1.bf16.msra.mxu1 %v2809_v50  ;;  %v2883_v50 = vld [vmem:[#allocation5 + $0x34c] ss:$16 sps:$4 sm:$0xff]  }
  0xb4   :  { %1399 = vmatpush1.bf16.msra.mxu0 %v2806_v49  ;;  %1482 = vmatprep.subr.bf16.mxu1 %v2817_v52  ;;  %v2959_v49 = vld [vmem:[#allocation7 + $0x30] ss:$8 sps:$4 sm:$0xff]  }
  0xb5   :  { %1400 = vmatprep.subr.bf16.mxu0 %v2814_v51  ;;  %v2964_v51 = vld [vmem:[#allocation7 + $0x44] ss:$8 sps:$4 sm:$0xff]   ;;  %v2881_v52 = vld [vmem:[#allocation5 + $0x348] ss:$16 sps:$4 sm:$0xff]  }
  0xb7   :  { %1483 = vmatpush1.bf16.msra.mxu1 %v2815_v55  ;;  %v2886_v55 = vld [vmem:[#allocation5 + $0x36c] ss:$16 sps:$4 sm:$0xff]  }
  0xb8   :  { %1401 = vmatpush1.bf16.msra.mxu0 %v2812_v54  ;;  %1484 = vmatprep.subr.bf16.mxu1 %v2823_v57  ;;  %v2962_v54 = vld [vmem:[#allocation7 + $0x40] ss:$8 sps:$4 sm:$0xff]  }
  0xb9   :  { %1402 = vmatprep.subr.bf16.mxu0 %v2820_v56  ;;  %v2967_v56 = vld [vmem:[#allocation7 + $0x54] ss:$8 sps:$4 sm:$0xff]   ;;  %v2884_v57 = vld [vmem:[#allocation5 + $0x368] ss:$16 sps:$4 sm:$0xff]  }
  0xbb   :  { %1485 = vmatpush1.bf16.msra.mxu1 %v2821_v59  ;;  %v2889_v59 = vld [vmem:[#allocation5 + $0x38c] ss:$16 sps:$4 sm:$0xff]  }
  0xbc   :  { %1403 = vmatpush1.bf16.msra.mxu0 %v2818_v58  ;;  %1486 = vmatprep.subr.bf16.mxu1 %v2829_v61  ;;  %v2965_v58 = vld [vmem:[#allocation7 + $0x50] ss:$8 sps:$4 sm:$0xff]  }
  0xbd   :  { %1404 = vmatprep.subr.bf16.mxu0 %v2826_v60  ;;  %v2970_v60 = vld [vmem:[#allocation7 + $0x64] ss:$8 sps:$4 sm:$0xff]   ;;  %v2887_v61 = vld [vmem:[#allocation5 + $0x388] ss:$16 sps:$4 sm:$0xff]  }
  0xbf   :  { %1487 = vmatpush1.bf16.msra.mxu1 %v2827_v63  ;;  %v2892_v63 = vld [vmem:[#allocation5 + $0x3ac] ss:$16 sps:$4 sm:$0xff]  }
  0xc0   :  { %1405 = vmatpush1.bf16.msra.mxu0 %v2824_v62  ;;  %1488 = vmatprep.subr.bf16.mxu1 %v2835_v1  ;;  %v2968_v62 = vld [vmem:[#allocation7 + $0x60] ss:$8 sps:$4 sm:$0xff]  }
  0xc1   :  { %1406 = vmatprep.subr.bf16.mxu0 %v2832_v0  ;;  %v2973_v0 = vld [vmem:[#allocation7 + $0x74] ss:$8 sps:$4 sm:$0xff]   ;;  %v2890_v1 = vld [vmem:[#allocation5 + $0x3a8] ss:$16 sps:$4 sm:$0xff]  }
  0xc3   :  { %1489 = vmatpush1.bf16.msra.mxu1 %v2833_v3  ;;  %v2895_v3 = vld [vmem:[#allocation5 + $0x3cc] ss:$16 sps:$4 sm:$0xff]  }
  0xc4   :  { %1407 = vmatpush1.bf16.msra.mxu0 %v2830_v2  ;;  %1490 = vmatprep.subr.bf16.mxu1 %v2841_v5  ;;  %v2971_v2 = vld [vmem:[#allocation7 + $0x70] ss:$8 sps:$4 sm:$0xff]  }
  0xc5   :  { %1408 = vmatprep.subr.bf16.mxu0 %v2838_v4  ;;  %v2976_v4 = vld [vmem:[#allocation7 + $0x84] ss:$8 sps:$4 sm:$0xff]   ;;  %v2893_v5 = vld [vmem:[#allocation5 + $0x3c8] ss:$16 sps:$4 sm:$0xff]  }
  0xc7   :  { %1491 = vmatpush1.bf16.msra.mxu1 %v2839_v7  ;;  %v2898_v7 = vld [vmem:[#allocation5 + $0x3ec] ss:$16 sps:$4 sm:$0xff]  }
  0xc8   :  { %1409 = vmatpush1.bf16.msra.mxu0 %v2836_v6  ;;  %1492 = vmatprep.subr.bf16.mxu1 %v2847_v10  ;;  %v2974_v6 = vld [vmem:[#allocation7 + $0x80] ss:$8 sps:$4 sm:$0xff]  }
  0xc9   :  { %1410 = vmatprep.subr.bf16.mxu0 %v2844_v8  ;;  %v2979_v8 = vld [vmem:[#allocation7 + $0x94] ss:$8 sps:$4 sm:$0xff]   ;;  %v2896_v10 = vld [vmem:[#allocation5 + $0x3e8] ss:$16 sps:$4 sm:$0xff]  }
  0xcb   :  { %1493 = vmatpush1.bf16.msra.mxu1 %v2845_v13  ;;  %v2901_v13 = vld [vmem:[#allocation5 + $0x40c] ss:$16 sps:$4 sm:$0xff]  }
  0xcc   :  { %1411 = vmatpush1.bf16.msra.mxu0 %v2842_v11  ;;  %1503 = vmatprep.subr.bf16.mxu1 %v2850_v15  ;;  %v2977_v11 = vld [vmem:[#allocation7 + $0x90] ss:$8 sps:$4 sm:$0xff]  }
  0xcd   :  { %1421 = vmatprep.subr.bf16.mxu0 %v2856_v16  ;;  %v2899_v15 = vld [vmem:[#allocation5 + $0x408] ss:$16 sps:$4 sm:$0xff]   ;;  %v2904_v16 = vld [vmem:[#allocation5 + $0x42c] ss:$16 sps:$4 sm:$0xff]  }
  0xce   :  { %1495 = vmatmul.mubr.bf16.vlgmr.msra.gmra.mrb[4].mxu1 %v3268_v9  ;;  %v2865_v9 = vld [vmem:[#allocation5 + $0x28c] ss:$16 sps:$4 sm:$0xff]  }
  0xcf   :  { %1413 = vmatmul.mubr.bf16.vlgmr.msra.gmra.mrb[0].mxu0 %v3278_v17  ;;  %1504 = vmatpush1.bf16.msra.mxu1 %v2848_v18  ;;  %v2980_v18 = vld [vmem:[#allocation7 + $0xa0] ss:$8 sps:$4 sm:$0xff]  }
  0xd0   :  { %1422 = vmatpush1.bf16.msra.mxu0 %v2854_v19  ;;  %1505 = vmatprep.subr.bf16.mxu1 %v2853_v20  ;;  %v2985_v19 = vld [vmem:[#allocation7 + $0xb4] ss:$8 sps:$4 sm:$0xff]   ;;  %v2902_v20 = vld [vmem:[#allocation5 + $0x428] ss:$16 sps:$4 sm:$0xff]  }
  0xd1   :  { %1453 = vmatprep.mubr.bf16.mxu0 %v3170_v24  ;;  %1535 = vmatprep.mubr.bf16.mxu1 %v3264_v53  ;;  %v2871_v53 = vld [vmem:[#allocation5 + $0x2cc] ss:$16 sps:$4 sm:$0xff]  }
  0xd2   :  { %1585 = vmatprep.subr.bf16.mxu0 %v2946_v21  ;;  %v2907_v21 = vld [vmem:[#allocation5 + $0x44c] ss:$16 sps:$4 sm:$0xff]  }
  0xd3   :  { %1506 = vmatpush1.bf16.msra.mxu1 %v2851_v22  ;;  %v2983_v22 = vld [vmem:[#allocation7 + $0xb0] ss:$8 sps:$4 sm:$0xff]  }
  0xd4   :  { %1507 = vmatprep.subr.bf16.mxu1 %v2859_v23  ;;  %v2988_v23 = vld [vmem:[#allocation7 + $0xc4] ss:$8 sps:$4 sm:$0xff]  }
  0xd7   :  { %1508 = vmatpush1.bf16.msra.mxu1 %v2857_v25  ;;  %v2910_v25 = vld [vmem:[#allocation5 + $0x46c] ss:$16 sps:$4 sm:$0xff]  }
  0xd8   :  { %1509 = vmatprep.subr.bf16.mxu1 %v2862_v27  ;;  %v2991_v27 = vld [vmem:[#allocation7 + $0xd4] ss:$8 sps:$4 sm:$0xff]  }
  0xdb   :  { %2509 = vmatmul.mubr.msk.bf16.vlgmr.msra.gmra.mrb[0].mxu0 %vm1294_vm0, %v95_v30  ;;  %1510 = vmatpush1.bf16.msra.mxu1 %v2860_v28  ;;  %v2913_v28 = vld [vmem:[#allocation5 + $0x48c] ss:$16 sps:$4 sm:$0xff]  }
  0xdc   :  { %1586 = vmatpush1.bf16.msra.mxu0 %v2944_v29  ;;  %1511 = vmatprep.subr.bf16.mxu1 %v2865_v9  ;;  %v2911_v29 = vld [vmem:[#allocation5 + $0x488] ss:$16 sps:$4 sm:$0xff]  }
  0xdd   :  { %1617 = vmatprep.mubr.bf16.mxu0 %v3170_v24  ;;  %2034 = vmatprep.subr.bf16.mxu0 %v2952_v38  ;;  %v2905_v24 = vld [vmem:[#allocation5 + $0x448] ss:$16 sps:$4 sm:$0xff]   ;;  %v2994_v38 = vld [vmem:[#allocation7 + $0xe4] ss:$8 sps:$4 sm:$0xff]  }
  0xde   :  { %v2914_v9 = vld [vmem:[#allocation5 + $0x4a8] ss:$16 sps:$4 sm:$0xff]  }
  0xdf   :  { %1512 = vmatpush1.bf16.msra.mxu1 %v2863_v31  ;;  %v2919_v31 = vld [vmem:[#allocation5 + $0x4cc] ss:$16 sps:$4 sm:$0xff]  }
  0xe0   :  { %1513 = vmatprep.subr.bf16.mxu1 %v2868_v32  ;;  %v2917_v32 = vld [vmem:[#allocation5 + $0x4c8] ss:$16 sps:$4 sm:$0xff]  }
  0xe3   :  { %2510 = vmatmul.mubr.msk.bf16.vlgmr.msra.gmra.mrb[4].mxu0 %vm1294_vm0, %v95_v30  ;;  %1514 = vmatpush1.bf16.msra.mxu1 %v2866_v33  ;;  %v2916_v30 = vld [vmem:[#allocation5 + $0x4ac] ss:$16 sps:$4 sm:$0xff]  }
  0xe4   :  { %1515 = vmatprep.subr.bf16.mxu1 %v2871_v53  ;;  %2035 = vmatpush1.bf16.msra.mxu0 %v2950_v37  ;;  %v2922_v33 = vld [vmem:[#allocation5 + $0x4ec] ss:$16 sps:$4 sm:$0xff]   ;;  %v2920_v53 = vld [vmem:[#allocation5 + $0x4e8] ss:$16 sps:$4 sm:$0xff]  }
  0xe5   :  { %2036 = vmatprep.subr.bf16.mxu0 %v2955_v39  ;;  %v2928_v37 = vld [vmem:[#allocation5 + $0x52c] ss:$16 sps:$4 sm:$0xff]   ;;  %v2926_v39 = vld [vmem:[#allocation5 + $0x528] ss:$16 sps:$4 sm:$0xff]  }
  0xe7   :  { %1516 = vmatpush1.bf16.msra.mxu1 %v2869_v34  ;;  %v2925_v34 = vld [vmem:[#allocation5 + $0x50c] ss:$16 sps:$4 sm:$0xff]  }
  0xe8   :  { %1517 = vmatprep.subr.bf16.mxu1 %v2874_v35  ;;  %2037 = vmatpush1.bf16.msra.mxu0 %v2953_v41  ;;  %v2923_v35 = vld [vmem:[#allocation5 + $0x508] ss:$16 sps:$4 sm:$0xff]   ;;  %v2931_v41 = vld [vmem:[#allocation5 + $0x54c] ss:$16 sps:$4 sm:$0xff]  }
  0xe9   :  { %2038 = vmatprep.subr.bf16.mxu0 %v2958_v43  ;;  %v2929_v43 = vld [vmem:[#allocation5 + $0x548] ss:$16 sps:$4 sm:$0xff]  }
  0xeb   :  { %1518 = vmatpush1.bf16.msra.mxu1 %v2872_v40  ;;  %v2992_v40 = vld [vmem:[#allocation7 + $0xe0] ss:$8 sps:$4 sm:$0xff]  }
  0xec   :  { %1519 = vmatprep.subr.bf16.mxu1 %v2877_v42  ;;  %2039 = vmatpush1.bf16.msra.mxu0 %v2956_v45  ;;  %v2997_v42 = vld [vmem:[#allocation7 + $0xf4] ss:$8 sps:$4 sm:$0xff]  }
  0xed   :  { %2040 = vmatprep.subr.bf16.mxu0 %v2961_v47  ;;  %v2934_v45 = vld [vmem:[#allocation5 + $0x56c] ss:$16 sps:$4 sm:$0xff]  }
  0xee   :  { %v2937_v47 = vld [vmem:[#allocation5 + $0x58c] ss:$16 sps:$4 sm:$0xff]  }
  0xef   :  { %1520 = vmatpush1.bf16.msra.mxu1 %v2875_v44  ;;  %v2995_v44 = vld [vmem:[#allocation7 + $0xf0] ss:$8 sps:$4 sm:$0xff]  }
  0xf0   :  { %1521 = vmatprep.subr.bf16.mxu1 %v2880_v46  ;;  %2041 = vmatpush1.bf16.msra.mxu0 %v2959_v49  ;;  %v2932_v46 = vld [vmem:[#allocation5 + $0x568] ss:$16 sps:$4 sm:$0xff]  }
  0xf1   :  { %2042 = vmatprep.subr.bf16.mxu0 %v2964_v51  ;;  %v2935_v49 = vld [vmem:[#allocation5 + $0x588] ss:$16 sps:$4 sm:$0xff]  }
  0xf2   :  { %v2938_v51 = vld [vmem:[#allocation5 + $0x5a8] ss:$16 sps:$4 sm:$0xff]  }
  0xf3   :  { %1522 = vmatpush1.bf16.msra.mxu1 %v2878_v48  ;;  %v3000_v48 = vld [vmem:[#allocation7 + $0x104] ss:$8 sps:$4 sm:$0xff]  }
  0xf4   :  { %1523 = vmatprep.subr.bf16.mxu1 %v2883_v50  ;;  %2043 = vmatpush1.bf16.msra.mxu0 %v2962_v54  ;;  %v2940_v50 = vld [vmem:[#allocation5 + $0x5ac] ss:$16 sps:$4 sm:$0xff]   ;;  %v2941_v54 = vld [vmem:[#allocation5 + $0x5c8] ss:$16 sps:$4 sm:$0xff]  }
  0xf5   :  { %2044 = vmatprep.subr.bf16.mxu0 %v2967_v56  ;;  %v2947_v56 = vld [vmem:[#allocation5 + $0x5e8] ss:$16 sps:$4 sm:$0xff]  }
  0xf7   :  { %1524 = vmatpush1.bf16.msra.mxu1 %v2881_v52  ;;  %v2943_v52 = vld [vmem:[#allocation5 + $0x5cc] ss:$16 sps:$4 sm:$0xff]  }
  0xf8   :  { %1525 = vmatprep.subr.bf16.mxu1 %v2886_v55  ;;  %2045 = vmatpush1.bf16.msra.mxu0 %v2965_v58  ;;  %v2949_v55 = vld [vmem:[#allocation5 + $0x5ec] ss:$16 sps:$4 sm:$0xff]  }
  0xf9   :  { %2046 = vmatprep.subr.bf16.mxu0 %v2970_v60 }
  0xfb   :  { %1526 = vmatpush1.bf16.msra.mxu1 %v2884_v57 }
  0xfc   :  { %1527 = vmatprep.subr.bf16.mxu1 %v2889_v59  ;;  %2047 = vmatpush1.bf16.msra.mxu0 %v2968_v62 }
  0xfd   :  { %2048 = vmatprep.subr.bf16.mxu0 %v2973_v0  ;;  %v3292_v0 = vld [vmem:[%s3323_s2] sm:$0xf] }
  0xff   :  { %1528 = vmatpush1.bf16.msra.mxu1 %v2887_v61  ;;  %v294_v61 = vlaneseq }
 0x100   :  { %1529 = vmatprep.subr.bf16.mxu1 %v2892_v63  ;;  %2049 = vmatpush1.bf16.msra.mxu0 %v2971_v2 }
 0x101   :  { %2050 = vmatprep.subr.bf16.mxu0 %v2976_v4  ;;  %v3286_v62 = vshrl.u32 %v294_v61, 7  ;;  %v3040_v61 = vld [vmem:[#allocation7 + $0x1e0] ss:$8 sps:$4 sm:$0xff]  }
 0x103   :  { %1530 = vmatpush1.bf16.msra.mxu1 %v2890_v1  ;;  %v296_v63 = vsub.s32 0, %v3286_v62  ;;  %v300_v1 = vsub.s32 1, %v3286_v62 }
 0x104   :  { %1531 = vmatprep.subr.bf16.mxu1 %v2895_v3  ;;  %2051 = vmatpush1.bf16.msra.mxu0 %v2974_v6 }
 0x105   :  { %2052 = vmatprep.subr.bf16.mxu0 %v2979_v8  ;;  %v301_v2 = vrot.slane %v3292_v0, %v300_v1  ;;  %v3046_v8 = vld [vmem:[#allocation8 + $0x40] sm:$0xff]  }
 0x107   :  { %1532 = vmatpush1.bf16.msra.mxu1 %v2893_v5 }
 0x108   :  { %1533 = vmatprep.subr.bf16.mxu1 %v2898_v7  ;;  %2053 = vmatpush1.bf16.msra.mxu0 %v2977_v11  ;;  %v3048_v11 = vld [vmem:[#allocation8 + $0x48] sm:$0xff]  }
 0x109   :  { %2054 = vmatprep.subr.bf16.mxu0 %v2982_v14 }
 0x10b   :  { %1534 = vmatpush1.bf16.msra.mxu1 %v2896_v10  ;;  %v3047_v10 = vld [vmem:[#allocation8] sm:$0xff]  }
 0x10c   :  { %1544 = vmatprep.subr.bf16.mxu1 %v2901_v13  ;;  %2055 = vmatpush1.bf16.msra.mxu0 %v2980_v18 }
 0x10d   :  { %2056 = vmatprep.subr.bf16.mxu0 %v2985_v19  ;;  %v3049_v19 = vld [vmem:[#allocation8 + $0x8] sm:$0xff]  }
 0x10e   :  { %1536 = vmatmul.mubr.bf16.vlgmr.msra.gmra.mrb[4].mxu1 %v3270_v12  ;;  %v2908_v12 = vld [vmem:[#allocation5 + $0x468] ss:$16 sps:$4 sm:$0xff]  }
 0x10f   :  { %1545 = vmatpush1.bf16.msra.mxu1 %v2899_v15  ;;  %1576 = vmatprep.mubr.bf16.mxu1 %v3275_v36  ;;  %v2989_v36 = vld [vmem:[#allocation7 + $0xd0] ss:$8 sps:$4 sm:$0xff]  }
 0x110   :  { %1546 = vmatprep.subr.bf16.mxu1 %v2904_v16  ;;  %2057 = vmatpush1.bf16.msra.mxu0 %v2983_v22 }
 0x111   :  { %2058 = vmatprep.subr.bf16.mxu0 %v2988_v23 }
 0x113   :  { %1547 = vmatpush1.bf16.msra.mxu1 %v2902_v20 }
 0x114   :  { %1548 = vmatprep.subr.bf16.mxu1 %v2907_v21  ;;  %2059 = vmatpush1.bf16.msra.mxu0 %v2986_v26  ;;  %v3050_v21 = vld [vmem:[#allocation8 + $0x50] sm:$0xff]  }
 0x115   :  { %2060 = vmatprep.subr.bf16.mxu0 %v2991_v27  ;;  %v3051_v26 = vld [vmem:[#allocation8 + $0x10] sm:$0xff]  }
 0x117   :  { %1549 = vmatpush1.bf16.msra.mxu1 %v2905_v24  ;;  %v2998_v24 = vld [vmem:[#allocation7 + $0x100] ss:$8 sps:$4 sm:$0xff]  }
 0x118   :  { %1550 = vmatprep.subr.bf16.mxu1 %v2910_v25  ;;  %2061 = vmatpush1.bf16.msra.mxu0 %v2989_v36  ;;  %v3052_v36 = vld [vmem:[#allocation8 + $0x58] sm:$0xff]  }
 0x119   :  { %2062 = vmatprep.subr.bf16.mxu0 %v2994_v38  ;;  %v3007_v38 = vld [vmem:[#allocation7 + $0x130] ss:$8 sps:$4 sm:$0xff]  }
 0x11b   :  { %1551 = vmatpush1.bf16.msra.mxu1 %v2908_v12  ;;  %v3003_v12 = vld [vmem:[#allocation7 + $0x114] ss:$8 sps:$4 sm:$0xff]  }
 0x11c   :  { %1552 = vmatprep.subr.bf16.mxu1 %v2913_v28  ;;  %2063 = vmatpush1.bf16.msra.mxu0 %v2992_v40  ;;  %v3010_v40 = vld [vmem:[#allocation7 + $0x140] ss:$8 sps:$4 sm:$0xff]  }
 0x11d   :  { %2064 = vmatprep.subr.bf16.mxu0 %v2997_v42  ;;  %v3013_v42 = vld [vmem:[#allocation7 + $0x150] ss:$8 sps:$4 sm:$0xff]  }
 0x11f   :  { %1553 = vmatpush1.bf16.msra.mxu1 %v2911_v29 }
 0x120   :  { %1554 = vmatprep.subr.bf16.mxu1 %v2916_v30  ;;  %2065 = vmatpush1.bf16.msra.mxu0 %v2995_v44  ;;  %v3016_v44 = vld [vmem:[#allocation7 + $0x160] ss:$8 sps:$4 sm:$0xff]  }
 0x121   :  { %2075 = vmatprep.subr.bf16.mxu0 %v3000_v48  ;;  %v3022_v48 = vld [vmem:[#allocation7 + $0x180] ss:$8 sps:$4 sm:$0xff]  }
 0x123   :  { %1555 = vmatpush1.bf16.msra.mxu1 %v2914_v9  ;;  %v3001_v9 = vld [vmem:[#allocation7 + $0x110] ss:$8 sps:$4 sm:$0xff]  }
 0x124   :  { %1556 = vmatprep.subr.bf16.mxu1 %v2919_v31  ;;  %v3053_v31 = vld [vmem:[#allocation8 + $0x18] sm:$0xff]  }
 0x127   :  { %1557 = vmatpush1.bf16.msra.mxu1 %v2917_v32  ;;  %v3006_v32 = vld [vmem:[#allocation7 + $0x124] ss:$8 sps:$4 sm:$0xff]  }
 0x128   :  { %1558 = vmatprep.subr.bf16.mxu1 %v2922_v33  ;;  %v3054_v33 = vld [vmem:[#allocation8 + $0x60] sm:$0xff]  }
 0x12b   :  { %1559 = vmatpush1.bf16.msra.mxu1 %v2920_v53  ;;  %v3004_v53 = vld [vmem:[#allocation7 + $0x120] ss:$8 sps:$4 sm:$0xff]  }
 0x12c   :  { %1560 = vmatprep.subr.bf16.mxu1 %v2925_v34  ;;  %v3055_v34 = vld [vmem:[#allocation8 + $0x20] sm:$0xff]  }
 0x12f   :  { %1561 = vmatpush1.bf16.msra.mxu1 %v2923_v35  ;;  %v3009_v35 = vld [vmem:[#allocation7 + $0x134] ss:$8 sps:$4 sm:$0xff]  }
 0x130   :  { %1562 = vmatprep.subr.bf16.mxu1 %v2928_v37  ;;  %v3056_v37 = vld [vmem:[#allocation8 + $0x68] sm:$0xff]  }
 0x133   :  { %1563 = vmatpush1.bf16.msra.mxu1 %v2926_v39  ;;  %v3012_v39 = vld [vmem:[#allocation7 + $0x144] ss:$8 sps:$4 sm:$0xff]  }
 0x134   :  { %1564 = vmatprep.subr.bf16.mxu1 %v2931_v41  ;;  %v3015_v41 = vld [vmem:[#allocation7 + $0x154] ss:$8 sps:$4 sm:$0xff]  }
 0x137   :  { %1565 = vmatpush1.bf16.msra.mxu1 %v2929_v43  ;;  %v3018_v43 = vld [vmem:[#allocation7 + $0x164] ss:$8 sps:$4 sm:$0xff]  }
 0x138   :  { %1566 = vmatprep.subr.bf16.mxu1 %v2934_v45  ;;  %v3021_v45 = vld [vmem:[#allocation7 + $0x174] ss:$8 sps:$4 sm:$0xff]  }
 0x13b   :  { %1567 = vmatpush1.bf16.msra.mxu1 %v2932_v46  ;;  %v3019_v46 = vld [vmem:[#allocation7 + $0x170] ss:$8 sps:$4 sm:$0xff]  }
 0x13c   :  { %1568 = vmatprep.subr.bf16.mxu1 %v2937_v47  ;;  %v3024_v47 = vld [vmem:[#allocation7 + $0x184] ss:$8 sps:$4 sm:$0xff]  }
 0x13f   :  { %1569 = vmatpush1.bf16.msra.mxu1 %v2935_v49  ;;  %v3027_v49 = vld [vmem:[#allocation7 + $0x194] ss:$8 sps:$4 sm:$0xff]  }
 0x140   :  { %1570 = vmatprep.subr.bf16.mxu1 %v2940_v50  ;;  %v3025_v50 = vld [vmem:[#allocation7 + $0x190] ss:$8 sps:$4 sm:$0xff]  }
 0x143   :  { %1571 = vmatpush1.bf16.msra.mxu1 %v2938_v51  ;;  %v3030_v51 = vld [vmem:[#allocation7 + $0x1a4] ss:$8 sps:$4 sm:$0xff]  }
 0x144   :  { %1572 = vmatprep.subr.bf16.mxu1 %v2943_v52  ;;  %v3028_v52 = vld [vmem:[#allocation7 + $0x1a0] ss:$8 sps:$4 sm:$0xff]  }
 0x147   :  { %1573 = vmatpush1.bf16.msra.mxu1 %v2941_v54  ;;  %v3033_v54 = vld [vmem:[#allocation7 + $0x1b4] ss:$8 sps:$4 sm:$0xff]  }
 0x148   :  { %1574 = vmatprep.subr.bf16.mxu1 %v2949_v55  ;;  %v3031_v55 = vld [vmem:[#allocation7 + $0x1b0] ss:$8 sps:$4 sm:$0xff]  }
 0x14b   :  { %1575 = vmatpush1.bf16.msra.mxu1 %v2947_v56  ;;  %v3036_v56 = vld [vmem:[#allocation7 + $0x1c4] ss:$8 sps:$4 sm:$0xff]  }
 0x14c   :  { %2593 = vmatprep.subr.bf16.mxu1 %v3046_v8 }
 0x14e   :  { %1577 = vmatmul.mubr.bf16.vlgmr.msra.gmra.mrb[4].mxu1 %v3278_v17  ;;  %v297_v17 = vrot.slane %v3292_v0, %v296_v63 }
 0x14f   :  { %2594 = vmatpush3.bf16.msra.mxu1 %v3047_v10 }
 0x150   :  { %2595 = vmatprep.subr.bf16.mxu1 %v3048_v11 }
 0x153   :  { %2596 = vmatpush3.bf16.msra.mxu1 %v3049_v19 }
 0x154   :  { %2597 = vmatprep.subr.bf16.mxu1 %v3050_v21 }
 0x157   :  { %2598 = vmatpush3.bf16.msra.mxu1 %v3051_v26  ;;  %v3059_v26 = vld [vmem:[#allocation8 + $0x30] sm:$0xff]  }
 0x158   :  { %2599 = vmatprep.subr.bf16.mxu1 %v3052_v36 }
 0x15b   :  { %2600 = vmatpush3.bf16.msra.mxu1 %v3053_v31 }
 0x15c   :  { %2601 = vmatprep.subr.bf16.mxu1 %v3054_v33 }
 0x15f   :  { %2602 = vmatpush3.bf16.msra.mxu1 %v3055_v34 }
 0x160   :  { %2603 = vmatprep.subr.bf16.mxu1 %v3056_v37 }
 0x161   :  { %v1332_v57 = vpop.f32.mrb[0].mxu1 }
 0x162   :  { %v1334_v58 = vpop.f32.mrb[1].mxu1  ;;  %v1333_v3 = vadd.f32 %v1332_v57, %v297_v17  ;;  %v3034_v57 = vld [vmem:[#allocation7 + $0x1c0] ss:$8 sps:$4 sm:$0xff]   ;;  %v3045_v17 = vld [vmem:[#allocation7 + $0x1f4] ss:$8 sps:$4 sm:$0xff]  }
 0x163   :  { %v1336_v59 = vpop.f32.mrb[2].mxu1  ;;  %v1335_v4 = vadd.f32 %v1334_v58, %v301_v2  ;;  %v3039_v58 = vld [vmem:[#allocation7 + $0x1d4] ss:$8 sps:$4 sm:$0xff]   ;;  %v3043_v2 = vld [vmem:[#allocation7 + $0x1f0] ss:$8 sps:$4 sm:$0xff]  }
 0x164   :  { %v1337_v60 = vpop.f32.mrb[3].mxu1  ;;  %v3037_v59 = vld [vmem:[#allocation7 + $0x1d0] ss:$8 sps:$4 sm:$0xff]  }
 0x165   :  { %v3042_v60 = vld [vmem:[#allocation7 + $0x1e4] ss:$8 sps:$4 sm:$0xff]  }
 0x1ae   :  { %v1455_v5 = vpop.f32.mrb[0].mxu0 }
 0x1af   :  { %v2616_v6 = vadd.f32 %v1455_v5, %v1333_v3  ;;  %v1457_v7 = vpop.f32.mrb[1].mxu0  ;;  %v304_v3 = vsub.s32 2, %v3286_v62 }
 0x1b0   :  { %v2618_v13 = vadd.f32 %v1457_v7, %v1335_v4  ;;  %v1459_v14 = vpop.f32.mrb[2].mxu0  ;;  %v308_v4 = vsub.s32 3, %v3286_v62 }
 0x1b1   :  { %v1626_v15 = vmul.f32 0.2, %v2616_v6  ;;  %v1460_v16 = vpop.f32.mrb[3].mxu0  ;;  %v305_v5 = vrot.slane %v3292_v0, %v304_v3 }
 0x1b2   :  { %v1627_v18 = vmul.f32 0.2, %v2618_v13 }
 0x1b3   :  { %v1630_v20 = vmax.f32 %v2616_v6, %v1626_v15  ;;  %v309_v6 = vrot.slane %v3292_v0, %v308_v4  ;;  %v3058_v0 = vld [vmem:[#allocation8 + $0x70] sm:$0xff]  }
 0x1b4   :  { %v1631_v22 = vmax.f32 %v2618_v13, %v1627_v18 }
 0x1b5   :  { %v1634_v27 = vpack.c.bf16 %v1630_v20, %v1630_v20 }
 0x1b6   :  { %v1635_v23 = vpack.c.bf16 %v1631_v22, %v1631_v22  ;;  %v3301_v25 = vpop.f32.mrb[4].mxu0 }
 0x1b7   :  { %v3303_v28 = vpop.f32.mrb[5].mxu0 }
 0x1b8   :  { %2066 = vmatprep.mubr.bf16.mxu0 %v1635_v23  ;;  %v1623_v29 = vpop.f32.mrb[6].mxu0 }
 0x1b9   :  { %2067 = vmatmul.mubr.bf16.vlgmr.msra.gmra.mrb[8].mxu0 %v1634_v27  ;;  %v1624_v30 = vpop.f32.mrb[7].mxu0  ;;  %v3060_v27 = vld [vmem:[#allocation8 + $0x78] sm:$0xff]  }
 0x1ba   :  { %2076 = vmatpush1.bf16.msra.mxu0 %v2998_v24  ;;  %v3057_v24 = vld [vmem:[#allocation8 + $0x28] sm:$0xff]  }
 0x1bb   :  { %2077 = vmatprep.subr.bf16.mxu0 %v3003_v12  ;;  %2604 = vmatpush3.bf16.msra.mxu1 %v3057_v24  ;;  %v3061_v12 = vld [vmem:[#allocation8 + $0x38] sm:$0xff]  }
 0x1bc   :  { %2605 = vmatprep.subr.bf16.mxu1 %v3058_v0 }
 0x1be   :  { %2078 = vmatpush1.bf16.msra.mxu0 %v3001_v9 }
 0x1bf   :  { %2079 = vmatprep.subr.bf16.mxu0 %v3006_v32  ;;  %2606 = vmatpush3.bf16.msra.mxu1 %v3059_v26 }
 0x1c0   :  { %2607 = vmatprep.subr.bf16.mxu1 %v3060_v27 }
 0x1c2   :  { %2080 = vmatpush1.bf16.msra.mxu0 %v3004_v53 }
 0x1c3   :  { %2081 = vmatprep.subr.bf16.mxu0 %v3009_v35  ;;  %2608 = vmatpush3.bf16.msra.mxu1 %v3061_v12 }
 0x1c6   :  { %2082 = vmatpush1.bf16.msra.mxu0 %v3007_v38 }
 0x1c7   :  { %2083 = vmatprep.subr.bf16.mxu0 %v3012_v39 }
 0x1ca   :  { %2084 = vmatpush1.bf16.msra.mxu0 %v3010_v40 }
 0x1cb   :  { %2085 = vmatprep.subr.bf16.mxu0 %v3015_v41 }
 0x1ce   :  { %2086 = vmatpush1.bf16.msra.mxu0 %v3013_v42 }
 0x1cf   :  { %2087 = vmatprep.subr.bf16.mxu0 %v3018_v43 }
 0x1d2   :  { %2088 = vmatpush1.bf16.msra.mxu0 %v3016_v44 }
 0x1d3   :  { %2089 = vmatprep.subr.bf16.mxu0 %v3021_v45 }
 0x1d6   :  { %2090 = vmatpush1.bf16.msra.mxu0 %v3019_v46 }
 0x1d7   :  { %2091 = vmatprep.subr.bf16.mxu0 %v3024_v47 }
 0x1da   :  { %2092 = vmatpush1.bf16.msra.mxu0 %v3022_v48 }
 0x1db   :  { %2093 = vmatprep.subr.bf16.mxu0 %v3027_v49 }
 0x1de   :  { %2094 = vmatpush1.bf16.msra.mxu0 %v3025_v50 }
 0x1df   :  { %2095 = vmatprep.subr.bf16.mxu0 %v3030_v51 }
 0x1e2   :  { %2096 = vmatpush1.bf16.msra.mxu0 %v3028_v52 }
 0x1e3   :  { %2097 = vmatprep.subr.bf16.mxu0 %v3033_v54 }
 0x1e6   :  { %2098 = vmatpush1.bf16.msra.mxu0 %v3031_v55 }
 0x1e7   :  { %2099 = vmatprep.subr.bf16.mxu0 %v3036_v56 }
 0x1ea   :  { %2100 = vmatpush1.bf16.msra.mxu0 %v3034_v57 }
 0x1eb   :  { %2101 = vmatprep.subr.bf16.mxu0 %v3039_v58 }
 0x1ee   :  { %2102 = vmatpush1.bf16.msra.mxu0 %v3037_v59 }
 0x1ef   :  { %2103 = vmatprep.subr.bf16.mxu0 %v3042_v60 }
 0x1f2   :  { %2104 = vmatpush1.bf16.msra.mxu0 %v3040_v61 }
 0x1f3   :  { %2105 = vmatprep.subr.bf16.mxu0 %v3045_v17 }
 0x1f6   :  { %2106 = vmatpush1.bf16.msra.mxu0 %v3043_v2 }
 0x221   :  { %v1578_v7 = vpop.f32.mrb[4].mxu1 }
 0x222   :  { %v2619_v8 = vadd.f32 %v1578_v7, %v305_v5  ;;  %v1580_v10 = vpop.f32.mrb[5].mxu1 }
 0x223   :  { %v2621_v11 = vadd.f32 %v1580_v10, %v309_v6  ;;  %v1582_v13 = vpop.f32.mrb[6].mxu1 }
 0x224   :  { %v2620_v14 = vadd.f32 %v2619_v8, %v3301_v25  ;;  %v1583_v15 = vpop.f32.mrb[7].mxu1  ;;  %v1702_v25 = vld [vmem:[%s3325_s4] sm:$0x3] }
 0x225   :  { %v2622_v16 = vadd.f32 %v2621_v11, %v3303_v28  ;;  %v1707_v28 = vrot.slane %v1702_v25, %v296_v63  ;;  %v1711_v36 = vrot.slane %v1702_v25, %v300_v1  ;;  %v2591_v63 = vld [vmem:[#allocation2] ss:$0 sm:$0xff] }
 0x226   :  { %v1628_v18 = vmul.f32 0.2, %v2620_v14 }
 0x227   :  { %v1629_v19 = vmul.f32 0.2, %v2622_v16 }
 0x228   :  { %v1632_v20 = vmax.f32 %v2620_v14, %v1628_v18 }
 0x229   :  { %v1633_v21 = vmax.f32 %v2622_v16, %v1629_v19 }
 0x22a   :  { %v1636_v23 = vpack.c.bf16 %v1632_v20, %v1632_v20 }
 0x22b   :  { %v1637_v22 = vpack.c.bf16 %v1633_v21, %v1633_v21 }
 0x22d   :  { %2107 = vmatprep.mubr.bf16.mxu0 %v1637_v22 }
 0x22e   :  { %2108 = vmatmul.mubr.bf16.vlgmr.msra.gmra.mrb[8].mxu0 %v1636_v23 }
 0x301   :  { %v2109_v29 = vpop.f32.mrb[8].mxu0 }
 0x302   :  { %v2623_v30 = vadd.f32 %v2109_v29, %v1707_v28  ;;  %v2111_v9 = vpop.f32.mrb[9].mxu0 }
 0x303   :  { %v2624_v31 = vadd.f32 %v2111_v9, %v1711_v36  ;;  %v2113_v32 = vpop.f32.mrb[10].mxu0 }
 0x304   :  { %v2116_v33 = vmul.f32 0.2, %v2623_v30  ;;  %v2114_v53 = vpop.f32.mrb[11].mxu0 }
 0x305   :  { %v2117_v34 = vmul.f32 0.2, %v2624_v31 }
 0x306   :  { %v2118_v35 = vmax.f32 %v2623_v30, %v2116_v33 }
 0x307   :  { %v2119_v37 = vmax.f32 %v2624_v31, %v2117_v34 }
 0x308   :  { %v2120_v39 = vpack.c.bf16 %v2118_v35, %v2118_v35 }
 0x309   :  { %v2121_v38 = vpack.c.bf16 %v2119_v37, %v2119_v37 }
 0x30b   :  { %2282 = vmatprep.mubr.bf16.mxu1 %v2121_v38 }
 0x30c   :  { %2283 = vmatmul.mubr.bf16.vlgmr.msra.gmra.mrb[8].mxu1 %v2120_v39 }
 0x3df   :  { %v2609_v40 = vpop.f32.mrb[8].mxu1 }
 0x3e0   :  { %v2610_v41 = vpop.f32.mrb[9].mxu1 }
 0x3e1   :  { %v2611_v42 = vadd.f32 %v2610_v41, %v2609_v40  ;;  %v2612_v62 = vpop.f32.mrb[10].mxu1 }
 0x3e2   :  { %v2613_v1 = vpop.f32.mrb[11].mxu1 }
 0x3e3   :  { %v2297_v43 = vadd.f32 %v2611_v42, %v2591_v63 }
 0x3e5   :  { %v2592_v44 = vmul.f32 -1.442695, %v2297_v43 }
 0x3e7   :  { %3062 = vpow2.f32 %v2592_v44 }
 0x3f1   :  { %v3063_v45 = vpop.eup %3062 }
 0x3f2   :  { %v2301_v46 = vadd.f32 1.0, %v3063_v45 }
 0x3f4   :  { %3064 = vrcp.f32 %v2301_v46 }
 0x3fe   :  { %v3065_v47 = vpop.eup %3064 }
 0x3ff   :  { %2305 = vst.msk [vmem:[%s3328_s7] sm:$0xff] %vm2304_vm1, %v3065_v47 }
 0x400   :  { %2310 = vsyncpa [#allocation4], 1 }
 0x401   :  { %2311 = vsyncpa [#allocation6], 1 }
 0x402   :  { %2312 = vsyncpa [#allocation9], 1 }

</bundles_post_ra>
